<compile_context>
chip_gen: v7x
topology: tpu7x:2x2x1
jax: 0.10.0
libtpu: 0.0.40
codegen_flags: <defaults>
</compile_context>

<pallas_src>
import functools
import math

import jax
import jax.numpy as jnp
from jax.experimental import pallas as pl
from jax.experimental.pallas import tpu as pltpu


# Sublane tile height per element byte-width (f32 -> 8, bf16/f16 -> 16,
# int8/fp8 -> 32).  Chunk boundaries along a 2-D array's leading (sublane)
# axis must respect it so every DMA descriptor covers whole (sublane, lane)
# tiles of the HBM layout.
_SUBLANE_MULT = {4: 8, 2: 16, 1: 32}
_LANE = 128

# Only split the copy into multiple overlapped DMAs when the parameter is at
# least this large; below it a single DMA already sits at the HBM roofline and
# extra descriptors are pure overhead (this also removes the old forced 2-way
# split for tiny parameters).
_CHUNK_THRESHOLD_BYTES = 4 * 1024 * 1024
_MAX_CHUNKS = 4


def _plan_chunks(shape, dtype):
    """Static (start, size) chunks along axis 0, or None for one whole-ref DMA."""
    if len(shape) == 0:
        return None
    itemsize = jnp.dtype(dtype).itemsize
    n_bytes = math.prod(shape) * itemsize
    if n_bytes < _CHUNK_THRESHOLD_BYTES:
        return None
    # Alignment requirement for chunk boundaries along axis 0.
    if len(shape) == 1:
        align = _SUBLANE_MULT.get(itemsize, 8) * _LANE
    elif len(shape) == 2:
        align = _SUBLANE_MULT.get(itemsize, 8)
    else:
        align = 1  # axis 0 is a pure leading dim; any split is tile-aligned
    dim0 = shape[0]
    if dim0 < 2 * align:
        return None
    k = min(_MAX_CHUNKS, dim0 // align)
    base = (dim0 // k) // align * align
    if base == 0:
        return None
    chunks = []
    start = 0
    for _ in range(k - 1):
        chunks.append((start, base))
        start += base
    chunks.append((start, dim0 - start))
    return chunks


def _dma_copy_kernel(p_ref, o_ref, sem, *, chunks):
    # Pure HBM->HBM DMA copy: every byte moves exactly once over HBM in each
    # direction, with no VMEM round trip and no vector load/store bundles.
    if chunks is None:
        cp = pltpu.make_async_copy(p_ref, o_ref, sem.at[0])
        cp.start()
        cp.wait()
        return
    copies = []
    for i, (start, size) in enumerate(chunks):
        cp = pltpu.make_async_copy(
            p_ref.at[pl.ds(start, size)],
            o_ref.at[pl.ds(start, size)],
            sem.at[i],
        )
        cp.start()  # start all chunks first so the DMAs overlap
        copies.append(cp)
    for cp in copies:
        cp.wait()


def parameter_forward(param: jax.Array) -> jax.Array:
    """Materialize the parameter into a fresh buffer via an HBM->HBM DMA copy.

    NOTE: the module's forward() is a pure identity, so the fastest correct
    implementation is simply returning `param` (see ParameterModule below).
    This kernel is only for callers that explicitly need a fresh buffer.
    """
    if param.size == 0:
        # Nothing to copy; the (empty) alias is the only sensible result.
        return param

    orig_ndim = param.ndim
    src = param.reshape((1,)) if orig_ndim == 0 else param

    chunks = _plan_chunks(src.shape, src.dtype)
    num_sems = 1 if chunks is None else len(chunks)
    nbytes = src.size * jnp.dtype(src.dtype).itemsize

    out = pl.pallas_call(
        functools.partial(_dma_copy_kernel, chunks=chunks),
        out_shape=jax.ShapeDtypeStruct(src.shape, src.dtype),
        in_specs=[pl.BlockSpec(memory_space=pl.ANY)],
        out_specs=pl.BlockSpec(memory_space=pl.ANY),
        scratch_shapes=[pltpu.SemaphoreType.DMA((num_sems,))],
        # Memory-only custom call: helps XLA schedule/overlap it.
        cost_estimate=pl.CostEstimate(
            flops=0, transcendentals=0, bytes_accessed=2 * nbytes),
    )(src)

    return out.reshape(param.shape) if orig_ndim == 0 else out


class ParameterModule:
    """JAX mirror of the PyTorch `Parameter` nn.Module."""

    def __init__(self, data: jax.Array):
        # Deterministic "parameter" storage (no checkpoint loading).
        self._parameter = data

    def __call__(self, *, materialize: bool = False) -> jax.Array:
        # forward(): return the parameter.
        #  - default: zero-cost alias (identical semantics, no HBM traffic)
        #  - materialize=True: fresh buffer via the HBM->HBM DMA Pallas kernel
        if materialize:
            return parameter_forward(self._parameter)
        return self._parameter

    @property
    def data(self) -> jax.Array:
        return self._parameter


if __name__ == "__main__":
    key = jax.random.PRNGKey(0)
    k0, k1, k2, k3, k4 = jax.random.split(key, 5)

    # Deterministic parameter-like tensors covering every code path:
    pos_emb = jax.random.normal(k0, (8, 128), dtype=jnp.float32)      # single DMA
    weight = jax.random.normal(k1, (64, 128), dtype=jnp.bfloat16)     # single DMA, bf16
    bias = jax.random.normal(k2, (7, 3), dtype=jnp.float32)           # odd shape, single DMA
    big = jax.random.normal(k3, (2048, 1024), dtype=jnp.float32)      # 8 MiB -> chunked DMAs
    scalar = jax.random.normal(k4, (), dtype=jnp.float32)             # 0-d path

    for data in (pos_emb, weight, bias, big, scalar):
        module = ParameterModule(data)
        out_alias = module()                    # default forward: identity alias
        out_copy = module(materialize=True)     # Pallas HBM->HBM DMA copy path
        jax.block_until_ready((out_alias, out_copy))

        assert out_alias.shape == data.shape and out_alias.dtype == data.dtype
        assert out_copy.shape == data.shape and out_copy.dtype == data.dtype
        assert bool(jnp.array_equal(out_alias, data))
        assert bool(jnp.array_equal(out_copy, data))

    print("KERNEL_OK")
</pallas_src>

<mosaic_0001>
module attributes {stable_mosaic.version = 11 : i64} {
  func.func @_dma_copy_kernel(%arg0: memref<8x128xf32, #tpu.memory_space<any>>, %arg1: memref<8x128xf32, #tpu.memory_space<any>>, %arg2: memref<1x!tpu.dma_semaphore, #tpu.memory_space<semaphore_mem>>) attributes {dimension_semantics = [], scalar_prefetch = 0 : i64, scratch_operands = 1 : i64, tpu.core_type = #tpu.core_type<tc>} {
    %c0_i32 = arith.constant 0 : i32
    %0 = tpu.memref_slice %arg2[%c0_i32] : memref<1x!tpu.dma_semaphore, #tpu.memory_space<semaphore_mem>> -> memref<1x!tpu.dma_semaphore, #tpu.memory_space<semaphore_mem>>
    %1 = tpu.memref_squeeze %0 : memref<1x!tpu.dma_semaphore, #tpu.memory_space<semaphore_mem>> -> memref<!tpu.dma_semaphore, #tpu.memory_space<semaphore_mem>>
    tpu.enqueue_dma source(%arg0 : memref<8x128xf32, #tpu.memory_space<any>>) target(%arg1 : memref<8x128xf32, #tpu.memory_space<any>>) target_semaphore(%1 : memref<!tpu.dma_semaphore, #tpu.memory_space<semaphore_mem>>)
    %c0_i32_0 = arith.constant 0 : i32
    %2 = tpu.memref_slice %arg2[%c0_i32_0] : memref<1x!tpu.dma_semaphore, #tpu.memory_space<semaphore_mem>> -> memref<1x!tpu.dma_semaphore, #tpu.memory_space<semaphore_mem>>
    %3 = tpu.memref_squeeze %2 : memref<1x!tpu.dma_semaphore, #tpu.memory_space<semaphore_mem>> -> memref<!tpu.dma_semaphore, #tpu.memory_space<semaphore_mem>>
    tpu.wait_dma2 semaphore(%3 : memref<!tpu.dma_semaphore, #tpu.memory_space<semaphore_mem>>) src(%arg0 : memref<8x128xf32, #tpu.memory_space<any>>) dst(%arg1 : memref<8x128xf32, #tpu.memory_space<any>>)
    return
  }
}

</mosaic_0001>

<bundles_post_ra>
// kernel: tpu_custom_call.1
= control target key start
LH: loop header
LB: loop body
LE: loop exit
PB: predicated region body
PF: predicated region fallthrough
CT: control target
= control target key end

     0   :  { %s34_s6 = smov [#allocation2]   ;;  %s35_s7 = smov [#allocation3]   ;;  %s53_s0 = inlined_call_operand.hbm [shape: f32[8,128], index: 0, kind: input, shape index: {}]   ;;  %s54_s1 = inlined_call_operand.hbm [shape: f32[8,128], index: 1, kind: output, shape index: {}]  }
   0x1   :  { %s36_s8 = smov 0  }
   0x2   :  { %18 = dma.general %s53_s0, 128, %s54_s1, %s34_s6, %s35_s7, [#allocation4], %s36_s8, 0  }
   0x3   :  { %32 = dma.done.wait [#allocation2], 128 }
   0x4   :  { %33 = vsyncadd [#allocation2], 4294967168 }
   0x5   :  { %22 = vsyncmov [#allocation2] }
   0x8   :  { %s23_s13 = vpop.sfrf %22 }
   0x9   :  { %p28_p0 = scmp.ne.s32.totalorder %s23_s13, 0 }
   0xb   :  { %27 = shalt.err (%p28_p0)  }

</bundles_post_ra>
